<compile_context>
chip_gen: v7x
topology: tpu7x:2x2x1
jax: 0.10.0
libtpu: 0.0.40
codegen_flags: <defaults>
</compile_context>

<pallas_src>
import jax
import jax.numpy as jnp
from jax.experimental import pallas as pl
from jax.experimental.pallas import tpu as pltpu

_SUB = 8     # sublanes per batch slab (one full f32 vreg of outputs per step)
_LANE = 128  # lanes per batch slab


def _round_up(x, m):
    return (x + m - 1) // m * m


# -----------------------------------------------------------------------------
# Kernel: one (8, 128) batch slab per grid step, VMEM-resident fused tables.
# -----------------------------------------------------------------------------
def _make_mf_slab_kernel(use_onehot_u, use_onehot_m):
    """Build the slab kernel with a statically chosen gather mechanism per table."""

    def kernel(uid_ref, mid_ref, uemb_ref, memb_ref, out_ref):
        # uid_ref, mid_ref : (8, 128)        int32 id slab
        # uemb_ref         : (d_pad, nu_pad) f32 augmented user table  (VMEM resident)
        # memb_ref         : (d_pad, nm_pad) f32 augmented movie table (VMEM resident)
        # out_ref          : (8, 128)        f32 output slab (full-vreg store)
        d_pad = uemb_ref.shape[0]
        rows, lanes = uid_ref.shape

        # Hoisted out of the row loop: table loads and (grid-invariant) iotas.
        utab = uemb_ref[...]
        mtab = memb_ref[...]
        uid = uid_ref[...]
        mid = mid_ref[...]
        iota_u = (jax.lax.broadcasted_iota(jnp.int32, (uemb_ref.shape[1], lanes), 0)
                  if use_onehot_u else None)
        iota_m = (jax.lax.broadcasted_iota(jnp.int32, (memb_ref.shape[1], lanes), 0)
                  if use_onehot_m else None)

        def gather_rows(tab, iota, ids_row, use_onehot):
            # ids_row: (1, lanes) int32 ; returns gathered rows as (d_pad, lanes).
            if use_onehot:
                # MXU one-hot gather: tab(d_pad, n_pad) @ onehot(n_pad, lanes).
                onehot = (iota == ids_row).astype(jnp.float32)
                return jnp.dot(tab, onehot, preferred_element_type=jnp.float32)
            # Single-span lane gather (XLU lane shuffle) when n_pad <= 128.
            idx = jnp.broadcast_to(ids_row, (d_pad, lanes))
            return jnp.take_along_axis(tab, idx, axis=1, mode="promise_in_bounds")

        out_rows = []
        for r in range(rows):  # statically unrolled short loop (LLO-visible)
            uid_r = uid[r:r + 1, :]                               # (1, lanes)
            mid_r = mid[r:r + 1, :]
            u = gather_rows(utab, iota_u, uid_r, use_onehot_u)    # (d_pad, lanes)
            m = gather_rows(mtab, iota_m, mid_r, use_onehot_m)    # (d_pad, lanes)
            # Fused dot + biases: extra feature rows carry (bias, 1) / (1, bias).
            out_rows.append(jnp.sum(u * m, axis=0, keepdims=True))  # (1, lanes)

        # Single unmasked full-tile store of the (8, 128) slab.
        out_ref[...] = jnp.concatenate(out_rows, axis=0)

    return kernel


# -----------------------------------------------------------------------------
# Table preparation (hoist out of the per-call path; cache per weight update).
# -----------------------------------------------------------------------------
def prepare_mf_tables(user_emb, movie_emb, user_bias, movie_bias):
    """Fuse biases into two extra feature columns and lay tables out as
    (feature, row) with (8, 128)-friendly padding.  Returns (u_tab, m_tab)."""
    num_users, d = user_emb.shape
    num_movies = movie_emb.shape[0]

    # user row = [emb | bias | 1], movie row = [emb | 1 | bias]  so that
    # sum(user_row * movie_row) = u.m + u_bias + m_bias.
    u_aug = jnp.concatenate(
        [user_emb.astype(jnp.float32),
         user_bias.reshape(num_users, 1).astype(jnp.float32),
         jnp.ones((num_users, 1), jnp.float32)], axis=1)                  # (NU, D+2)
    m_aug = jnp.concatenate(
        [movie_emb.astype(jnp.float32),
         jnp.ones((num_movies, 1), jnp.float32),
         movie_bias.reshape(num_movies, 1).astype(jnp.float32)], axis=1)  # (NM, D+2)

    d_aug = d + 2
    d_pad = _round_up(d_aug, 8)
    nu_pad = _round_up(num_users, _LANE)
    nm_pad = _round_up(num_movies, _LANE)
    u_tab = jnp.zeros((d_pad, nu_pad), jnp.float32).at[:d_aug, :num_users].set(u_aug.T)
    m_tab = jnp.zeros((d_pad, nm_pad), jnp.float32).at[:d_aug, :num_movies].set(m_aug.T)
    return u_tab, m_tab


# -----------------------------------------------------------------------------
# Forward: expects prepared tables; safe to wrap in jax.jit.
# -----------------------------------------------------------------------------
def mf_forward(user_ids, movie_ids, u_tab, m_tab):
    b = user_ids.shape[0]
    d_pad, nu_pad = u_tab.shape
    nm_pad = m_tab.shape[1]

    # Pad the batch to whole (8, 128) slabs; padded slots index row 0 of the
    # tables (always valid) and are dropped after the kernel.
    block = _SUB * _LANE
    b_pad = _round_up(max(b, 1), block)
    n_blk = b_pad // block
    row_tot = n_blk * _SUB
    uid = (jnp.zeros((b_pad,), jnp.int32).at[:b].set(user_ids.astype(jnp.int32))
           .reshape(row_tot, _LANE))
    mid = (jnp.zeros((b_pad,), jnp.int32).at[:b].set(movie_ids.astype(jnp.int32))
           .reshape(row_tot, _LANE))

    # Static gather-mechanism choice (no runtime/trace-time fallback).
    use_onehot_u = nu_pad > _LANE
    use_onehot_m = nm_pad > _LANE

    # VMEM budget from the actual footprint (tables + id/out slabs are
    # double-buffered by the default pipeline), with headroom; floor at the
    # 32 MiB scoped default, cap at v7x's 64 MiB physical VMEM.
    table_bytes = 4 * d_pad * (nu_pad + nm_pad)
    slab_bytes = 3 * (_SUB * _LANE * 4)
    need = 2 * table_bytes + 2 * slab_bytes
    vmem_limit = int(min(max(need + (8 << 20), 32 << 20), 64 << 20))

    out = pl.pallas_call(
        _make_mf_slab_kernel(use_onehot_u, use_onehot_m),
        out_shape=jax.ShapeDtypeStruct((row_tot, _LANE), jnp.float32),
        grid=(n_blk,),
        in_specs=[
            pl.BlockSpec((_SUB, _LANE), lambda i: (i, 0)),        # user id slab
            pl.BlockSpec((_SUB, _LANE), lambda i: (i, 0)),        # movie id slab
            pl.BlockSpec((d_pad, nu_pad), lambda i: (0, 0)),      # resident user table
            pl.BlockSpec((d_pad, nm_pad), lambda i: (0, 0)),      # resident movie table
        ],
        out_specs=pl.BlockSpec((_SUB, _LANE), lambda i: (i, 0)),
        compiler_params=pltpu.CompilerParams(
            # Independent output slabs -> shard across v7x's 2 TCs (no-op on
            # 1-TC v5e/v6e).  Note: each TC keeps its own resident-table copy.
            dimension_semantics=("parallel",),
            vmem_limit_bytes=vmem_limit,
        ),
    )(uid, mid, u_tab, m_tab)
    return out.reshape(b_pad)[:b]


def matrix_factorization_with_bias(user_ids, movie_ids,
                                   user_emb, movie_emb,
                                   user_bias, movie_bias):
    """Convenience one-shot forward.  For repeated inference, call
    prepare_mf_tables() once per weight update and reuse mf_forward()."""
    u_tab, m_tab = prepare_mf_tables(user_emb, movie_emb, user_bias, movie_bias)
    return mf_forward(user_ids, movie_ids, u_tab, m_tab)


if __name__ == "__main__":
    # --- primary test: small shapes, single-span lane-gather path ------------
    num_users, num_movies, D, B = 96, 112, 32, 200

    key = jax.random.PRNGKey(0)
    k_ue, k_me, k_ub, k_mb, k_uid, k_mid = jax.random.split(key, 6)

    user_emb = jax.random.normal(k_ue, (num_users, D), dtype=jnp.float32)
    movie_emb = jax.random.normal(k_me, (num_movies, D), dtype=jnp.float32)
    user_bias = jax.random.normal(k_ub, (num_users, 1), dtype=jnp.float32)
    movie_bias = jax.random.normal(k_mb, (num_movies, 1), dtype=jnp.float32)
    user_ids = jax.random.randint(k_uid, (B,), 0, num_users, dtype=jnp.int32)
    movie_ids = jax.random.randint(k_mid, (B,), 0, num_movies, dtype=jnp.int32)

    # Prepare tables once (per weight update), then run the jitted forward.
    u_tab, m_tab = jax.block_until_ready(
        prepare_mf_tables(user_emb, movie_emb, user_bias, movie_bias))
    fwd = jax.jit(mf_forward)
    out = jax.block_until_ready(fwd(user_ids, movie_ids, u_tab, m_tab))

    ref = ((user_emb[user_ids] * movie_emb[movie_ids]).sum(axis=1)
           + user_bias[user_ids, 0] + movie_bias[movie_ids, 0])
    assert out.shape == (B,)
    assert jnp.allclose(out, ref, atol=1e-4, rtol=1e-5), (out, ref)

    # --- secondary test: tables wider than one 128-lane span -----------------
    # Exercises the MXU one-hot gather path and a multi-slab grid (n_blk > 1).
    nu2, nm2, B2 = 300, 260, 1500
    k2 = jax.random.split(jax.random.PRNGKey(1), 6)
    ue2 = jax.random.normal(k2[0], (nu2, D), dtype=jnp.float32)
    me2 = jax.random.normal(k2[1], (nm2, D), dtype=jnp.float32)
    ub2 = jax.random.normal(k2[2], (nu2, 1), dtype=jnp.float32)
    mb2 = jax.random.normal(k2[3], (nm2, 1), dtype=jnp.float32)
    uid2 = jax.random.randint(k2[4], (B2,), 0, nu2, dtype=jnp.int32)
    mid2 = jax.random.randint(k2[5], (B2,), 0, nm2, dtype=jnp.int32)
    out2 = jax.block_until_ready(
        matrix_factorization_with_bias(uid2, mid2, ue2, me2, ub2, mb2))
    ref2 = ((ue2[uid2] * me2[mid2]).sum(axis=1) + ub2[uid2, 0] + mb2[mid2, 0])
    # Loose atol only to tolerate possible reduced-precision MXU passes in the
    # one-hot gather matmul; wrong gathers would be off by O(1).
    assert out2.shape == (B2,)
    assert jnp.allclose(out2, ref2, atol=2e-2, rtol=1e-3), (out2, ref2)

    print("KERNEL_OK")
</pallas_src>

<mosaic_0001>
module attributes {stable_mosaic.version = 11 : i64} {
  func.func @kernel(%arg0: i32, %arg1: memref<8x128xi32, #tpu.memory_space<vmem>>, %arg2: memref<8x128xi32, #tpu.memory_space<vmem>>, %arg3: memref<40x128xf32, #tpu.memory_space<vmem>>, %arg4: memref<40x128xf32, #tpu.memory_space<vmem>>, %arg5: memref<8x128xf32, #tpu.memory_space<vmem>>) attributes {dimension_semantics = [#tpu.dimension_semantics<parallel>], iteration_bounds = array<i64: 1>, scalar_prefetch = 0 : i64, scratch_operands = 0 : i64, tpu.core_type = #tpu.core_type<tc>, window_params = [{transform_indices = @transform_0, window_bounds = array<i64: 8, 128>}, {transform_indices = @transform_1, window_bounds = array<i64: 8, 128>}, {pipeline_mode = #tpu.pipeline_mode<synchronous>, transform_indices = @transform_2, window_bounds = array<i64: 40, 128>}, {pipeline_mode = #tpu.pipeline_mode<synchronous>, transform_indices = @transform_3, window_bounds = array<i64: 40, 128>}, {transform_indices = @transform_4, window_bounds = array<i64: 8, 128>}]} {
    %c0 = arith.constant 0 : index
    %c0_0 = arith.constant 0 : index
    %0 = vector.load %arg3[%c0, %c0_0] : memref<40x128xf32, #tpu.memory_space<vmem>>, vector<40x128xf32>
    %c0_1 = arith.constant 0 : index
    %c0_2 = arith.constant 0 : index
    %1 = vector.load %arg4[%c0_1, %c0_2] : memref<40x128xf32, #tpu.memory_space<vmem>>, vector<40x128xf32>
    %c0_3 = arith.constant 0 : index
    %c0_4 = arith.constant 0 : index
    %2 = vector.load %arg1[%c0_3, %c0_4] : memref<8x128xi32, #tpu.memory_space<vmem>>, vector<8x128xi32>
    %c0_5 = arith.constant 0 : index
    %c0_6 = arith.constant 0 : index
    %3 = vector.load %arg2[%c0_5, %c0_6] : memref<8x128xi32, #tpu.memory_space<vmem>>, vector<8x128xi32>
    %4 = vector.extract_strided_slice %2 {offsets = [0, 0], sizes = [1, 128], strides = [1, 1]} : vector<8x128xi32> to vector<1x128xi32>
    %5 = vector.extract_strided_slice %3 {offsets = [0, 0], sizes = [1, 128], strides = [1, 1]} : vector<8x128xi32> to vector<1x128xi32>
    %6 = vector.shape_cast %4 : vector<1x128xi32> to vector<1x128xi32>
    %7 = vector.broadcast %6 : vector<1x128xi32> to vector<40x128xi32>
    %8 = vector.shape_cast %7 : vector<40x128xi32> to vector<40x128x1xi32>
    %9 = vector.shape_cast %8 : vector<40x128x1xi32> to vector<40x128xi32>
    %10 = tpu.dynamic_gather %0[%9] in [1] : vector<40x128xf32>, vector<40x128xi32> -> vector<40x128xf32>
    %11 = vector.shape_cast %5 : vector<1x128xi32> to vector<1x128xi32>
    %12 = vector.broadcast %11 : vector<1x128xi32> to vector<40x128xi32>
    %13 = vector.shape_cast %12 : vector<40x128xi32> to vector<40x128x1xi32>
    %14 = vector.shape_cast %13 : vector<40x128x1xi32> to vector<40x128xi32>
    %15 = tpu.dynamic_gather %1[%14] in [1] : vector<40x128xf32>, vector<40x128xi32> -> vector<40x128xf32>
    %16 = arith.mulf %10, %15 : vector<40x128xf32>
    %cst = arith.constant dense<0.000000e+00> : vector<128xf32>
    %17 = vector.multi_reduction <add>, %16, %cst [0] : vector<40x128xf32> to vector<128xf32>
    %18 = vector.shape_cast %17 : vector<128xf32> to vector<1x128xf32>
    %19 = vector.extract_strided_slice %2 {offsets = [1, 0], sizes = [1, 128], strides = [1, 1]} : vector<8x128xi32> to vector<1x128xi32>
    %20 = vector.extract_strided_slice %3 {offsets = [1, 0], sizes = [1, 128], strides = [1, 1]} : vector<8x128xi32> to vector<1x128xi32>
    %21 = vector.shape_cast %19 : vector<1x128xi32> to vector<1x128xi32>
    %22 = vector.broadcast %21 : vector<1x128xi32> to vector<40x128xi32>
    %23 = vector.shape_cast %22 : vector<40x128xi32> to vector<40x128x1xi32>
    %24 = vector.shape_cast %23 : vector<40x128x1xi32> to vector<40x128xi32>
    %25 = tpu.dynamic_gather %0[%24] in [1] : vector<40x128xf32>, vector<40x128xi32> -> vector<40x128xf32>
    %26 = vector.shape_cast %20 : vector<1x128xi32> to vector<1x128xi32>
    %27 = vector.broadcast %26 : vector<1x128xi32> to vector<40x128xi32>
    %28 = vector.shape_cast %27 : vector<40x128xi32> to vector<40x128x1xi32>
    %29 = vector.shape_cast %28 : vector<40x128x1xi32> to vector<40x128xi32>
    %30 = tpu.dynamic_gather %1[%29] in [1] : vector<40x128xf32>, vector<40x128xi32> -> vector<40x128xf32>
    %31 = arith.mulf %25, %30 : vector<40x128xf32>
    %cst_7 = arith.constant dense<0.000000e+00> : vector<128xf32>
    %32 = vector.multi_reduction <add>, %31, %cst_7 [0] : vector<40x128xf32> to vector<128xf32>
    %33 = vector.shape_cast %32 : vector<128xf32> to vector<1x128xf32>
    %34 = vector.extract_strided_slice %2 {offsets = [2, 0], sizes = [1, 128], strides = [1, 1]} : vector<8x128xi32> to vector<1x128xi32>
    %35 = vector.extract_strided_slice %3 {offsets = [2, 0], sizes = [1, 128], strides = [1, 1]} : vector<8x128xi32> to vector<1x128xi32>
    %36 = vector.shape_cast %34 : vector<1x128xi32> to vector<1x128xi32>
    %37 = vector.broadcast %36 : vector<1x128xi32> to vector<40x128xi32>
    %38 = vector.shape_cast %37 : vector<40x128xi32> to vector<40x128x1xi32>
    %39 = vector.shape_cast %38 : vector<40x128x1xi32> to vector<40x128xi32>
    %40 = tpu.dynamic_gather %0[%39] in [1] : vector<40x128xf32>, vector<40x128xi32> -> vector<40x128xf32>
    %41 = vector.shape_cast %35 : vector<1x128xi32> to vector<1x128xi32>
    %42 = vector.broadcast %41 : vector<1x128xi32> to vector<40x128xi32>
    %43 = vector.shape_cast %42 : vector<40x128xi32> to vector<40x128x1xi32>
    %44 = vector.shape_cast %43 : vector<40x128x1xi32> to vector<40x128xi32>
    %45 = tpu.dynamic_gather %1[%44] in [1] : vector<40x128xf32>, vector<40x128xi32> -> vector<40x128xf32>
    %46 = arith.mulf %40, %45 : vector<40x128xf32>
    %cst_8 = arith.constant dense<0.000000e+00> : vector<128xf32>
    %47 = vector.multi_reduction <add>, %46, %cst_8 [0] : vector<40x128xf32> to vector<128xf32>
    %48 = vector.shape_cast %47 : vector<128xf32> to vector<1x128xf32>
    %49 = vector.extract_strided_slice %2 {offsets = [3, 0], sizes = [1, 128], strides = [1, 1]} : vector<8x128xi32> to vector<1x128xi32>
    %50 = vector.extract_strided_slice %3 {offsets = [3, 0], sizes = [1, 128], strides = [1, 1]} : vector<8x128xi32> to vector<1x128xi32>
    %51 = vector.shape_cast %49 : vector<1x128xi32> to vector<1x128xi32>
    %52 = vector.broadcast %51 : vector<1x128xi32> to vector<40x128xi32>
    %53 = vector.shape_cast %52 : vector<40x128xi32> to vector<40x128x1xi32>
    %54 = vector.shape_cast %53 : vector<40x128x1xi32> to vector<40x128xi32>
    %55 = tpu.dynamic_gather %0[%54] in [1] : vector<40x128xf32>, vector<40x128xi32> -> vector<40x128xf32>
    %56 = vector.shape_cast %50 : vector<1x128xi32> to vector<1x128xi32>
    %57 = vector.broadcast %56 : vector<1x128xi32> to vector<40x128xi32>
    %58 = vector.shape_cast %57 : vector<40x128xi32> to vector<40x128x1xi32>
    %59 = vector.shape_cast %58 : vector<40x128x1xi32> to vector<40x128xi32>
    %60 = tpu.dynamic_gather %1[%59] in [1] : vector<40x128xf32>, vector<40x128xi32> -> vector<40x128xf32>
    %61 = arith.mulf %55, %60 : vector<40x128xf32>
    %cst_9 = arith.constant dense<0.000000e+00> : vector<128xf32>
    %62 = vector.multi_reduction <add>, %61, %cst_9 [0] : vector<40x128xf32> to vector<128xf32>
    %63 = vector.shape_cast %62 : vector<128xf32> to vector<1x128xf32>
    %64 = vector.extract_strided_slice %2 {offsets = [4, 0], sizes = [1, 128], strides = [1, 1]} : vector<8x128xi32> to vector<1x128xi32>
    %65 = vector.extract_strided_slice %3 {offsets = [4, 0], sizes = [1, 128], strides = [1, 1]} : vector<8x128xi32> to vector<1x128xi32>
    %66 = vector.shape_cast %64 : vector<1x128xi32> to vector<1x128xi32>
    %67 = vector.broadcast %66 : vector<1x128xi32> to vector<40x128xi32>
    %68 = vector.shape_cast %67 : vector<40x128xi32> to vector<40x128x1xi32>
    %69 = vector.shape_cast %68 : vector<40x128x1xi32> to vector<40x128xi32>
    %70 = tpu.dynamic_gather %0[%69] in [1] : vector<40x128xf32>, vector<40x128xi32> -> vector<40x128xf32>
    %71 = vector.shape_cast %65 : vector<1x128xi32> to vector<1x128xi32>
    %72 = vector.broadcast %71 : vector<1x128xi32> to vector<40x128xi32>
    %73 = vector.shape_cast %72 : vector<40x128xi32> to vector<40x128x1xi32>
    %74 = vector.shape_cast %73 : vector<40x128x1xi32> to vector<40x128xi32>
    %75 = tpu.dynamic_gather %1[%74] in [1] : vector<40x128xf32>, vector<40x128xi32> -> vector<40x128xf32>
    %76 = arith.mulf %70, %75 : vector<40x128xf32>
    %cst_10 = arith.constant dense<0.000000e+00> : vector<128xf32>
    %77 = vector.multi_reduction <add>, %76, %cst_10 [0] : vector<40x128xf32> to vector<128xf32>
    %78 = vector.shape_cast %77 : vector<128xf32> to vector<1x128xf32>
    %79 = vector.extract_strided_slice %2 {offsets = [5, 0], sizes = [1, 128], strides = [1, 1]} : vector<8x128xi32> to vector<1x128xi32>
    %80 = vector.extract_strided_slice %3 {offsets = [5, 0], sizes = [1, 128], strides = [1, 1]} : vector<8x128xi32> to vector<1x128xi32>
    %81 = vector.shape_cast %79 : vector<1x128xi32> to vector<1x128xi32>
    %82 = vector.broadcast %81 : vector<1x128xi32> to vector<40x128xi32>
    %83 = vector.shape_cast %82 : vector<40x128xi32> to vector<40x128x1xi32>
    %84 = vector.shape_cast %83 : vector<40x128x1xi32> to vector<40x128xi32>
    %85 = tpu.dynamic_gather %0[%84] in [1] : vector<40x128xf32>, vector<40x128xi32> -> vector<40x128xf32>
    %86 = vector.shape_cast %80 : vector<1x128xi32> to vector<1x128xi32>
    %87 = vector.broadcast %86 : vector<1x128xi32> to vector<40x128xi32>
    %88 = vector.shape_cast %87 : vector<40x128xi32> to vector<40x128x1xi32>
    %89 = vector.shape_cast %88 : vector<40x128x1xi32> to vector<40x128xi32>
    %90 = tpu.dynamic_gather %1[%89] in [1] : vector<40x128xf32>, vector<40x128xi32> -> vector<40x128xf32>
    %91 = arith.mulf %85, %90 : vector<40x128xf32>
    %cst_11 = arith.constant dense<0.000000e+00> : vector<128xf32>
    %92 = vector.multi_reduction <add>, %91, %cst_11 [0] : vector<40x128xf32> to vector<128xf32>
    %93 = vector.shape_cast %92 : vector<128xf32> to vector<1x128xf32>
    %94 = vector.extract_strided_slice %2 {offsets = [6, 0], sizes = [1, 128], strides = [1, 1]} : vector<8x128xi32> to vector<1x128xi32>
    %95 = vector.extract_strided_slice %3 {offsets = [6, 0], sizes = [1, 128], strides = [1, 1]} : vector<8x128xi32> to vector<1x128xi32>
    %96 = vector.shape_cast %94 : vector<1x128xi32> to vector<1x128xi32>
    %97 = vector.broadcast %96 : vector<1x128xi32> to vector<40x128xi32>
    %98 = vector.shape_cast %97 : vector<40x128xi32> to vector<40x128x1xi32>
    %99 = vector.shape_cast %98 : vector<40x128x1xi32> to vector<40x128xi32>
    %100 = tpu.dynamic_gather %0[%99] in [1] : vector<40x128xf32>, vector<40x128xi32> -> vector<40x128xf32>
    %101 = vector.shape_cast %95 : vector<1x128xi32> to vector<1x128xi32>
    %102 = vector.broadcast %101 : vector<1x128xi32> to vector<40x128xi32>
    %103 = vector.shape_cast %102 : vector<40x128xi32> to vector<40x128x1xi32>
    %104 = vector.shape_cast %103 : vector<40x128x1xi32> to vector<40x128xi32>
    %105 = tpu.dynamic_gather %1[%104] in [1] : vector<40x128xf32>, vector<40x128xi32> -> vector<40x128xf32>
    %106 = arith.mulf %100, %105 : vector<40x128xf32>
    %cst_12 = arith.constant dense<0.000000e+00> : vector<128xf32>
    %107 = vector.multi_reduction <add>, %106, %cst_12 [0] : vector<40x128xf32> to vector<128xf32>
    %108 = vector.shape_cast %107 : vector<128xf32> to vector<1x128xf32>
    %109 = vector.extract_strided_slice %2 {offsets = [7, 0], sizes = [1, 128], strides = [1, 1]} : vector<8x128xi32> to vector<1x128xi32>
    %110 = vector.extract_strided_slice %3 {offsets = [7, 0], sizes = [1, 128], strides = [1, 1]} : vector<8x128xi32> to vector<1x128xi32>
    %111 = vector.shape_cast %109 : vector<1x128xi32> to vector<1x128xi32>
    %112 = vector.broadcast %111 : vector<1x128xi32> to vector<40x128xi32>
    %113 = vector.shape_cast %112 : vector<40x128xi32> to vector<40x128x1xi32>
    %114 = vector.shape_cast %113 : vector<40x128x1xi32> to vector<40x128xi32>
    %115 = tpu.dynamic_gather %0[%114] in [1] : vector<40x128xf32>, vector<40x128xi32> -> vector<40x128xf32>
    %116 = vector.shape_cast %110 : vector<1x128xi32> to vector<1x128xi32>
    %117 = vector.broadcast %116 : vector<1x128xi32> to vector<40x128xi32>
    %118 = vector.shape_cast %117 : vector<40x128xi32> to vector<40x128x1xi32>
    %119 = vector.shape_cast %118 : vector<40x128x1xi32> to vector<40x128xi32>
    %120 = tpu.dynamic_gather %1[%119] in [1] : vector<40x128xf32>, vector<40x128xi32> -> vector<40x128xf32>
    %121 = arith.mulf %115, %120 : vector<40x128xf32>
    %cst_13 = arith.constant dense<0.000000e+00> : vector<128xf32>
    %122 = vector.multi_reduction <add>, %121, %cst_13 [0] : vector<40x128xf32> to vector<128xf32>
    %123 = vector.shape_cast %122 : vector<128xf32> to vector<1x128xf32>
    %124 = tpu.concatenate %18, %33, %48, %63, %78, %93, %108, %123 in 0 : vector<1x128xf32>, vector<1x128xf32>, vector<1x128xf32>, vector<1x128xf32>, vector<1x128xf32>, vector<1x128xf32>, vector<1x128xf32>, vector<1x128xf32> -> vector<8x128xf32>
    %c0_14 = arith.constant 0 : index
    %c0_15 = arith.constant 0 : index
    %125 = vector.load %arg5[%c0_14, %c0_15] : memref<8x128xf32, #tpu.memory_space<vmem>>, vector<8x128xf32>
    tpu.vector_store %arg5[%c0_14, %c0_15], %124 {strides = array<i32>} : memref<8x128xf32, #tpu.memory_space<vmem>>, vector<8x128xf32>,
    return
  }
  func.func @transform_0(%arg0: i32) -> (i32, i32) {
    %c0_i32 = arith.constant 0 : i32
    %c0_i32_0 = arith.constant 0 : i32
    return %arg0, %c0_i32 : i32, i32
  }
  func.func @transform_1(%arg0: i32) -> (i32, i32) {
    %c0_i32 = arith.constant 0 : i32
    %c0_i32_0 = arith.constant 0 : i32
    return %arg0, %c0_i32 : i32, i32
  }
  func.func @transform_2(%arg0: i32) -> (i32, i32) {
    %c0_i32 = arith.constant 0 : i32
    %c0_i32_0 = arith.constant 0 : i32
    %c0_i32_1 = arith.constant 0 : i32
    return %c0_i32, %c0_i32_0 : i32, i32
  }
  func.func @transform_3(%arg0: i32) -> (i32, i32) {
    %c0_i32 = arith.constant 0 : i32
    %c0_i32_0 = arith.constant 0 : i32
    %c0_i32_1 = arith.constant 0 : i32
    return %c0_i32, %c0_i32_0 : i32, i32
  }
  func.func @transform_4(%arg0: i32) -> (i32, i32) {
    %c0_i32 = arith.constant 0 : i32
    %c0_i32_0 = arith.constant 0 : i32
    return %arg0, %c0_i32 : i32, i32
  }
}

</mosaic_0001>

<bundles_post_ra>
// kernel: mf_forward.1
= control target key start
LH: loop header
LB: loop body
LE: loop exit
PB: predicated region body
PF: predicated region fallthrough
CT: control target
= control target key end

     0   :  { %9 = vsyncpa [#allocation3], 0  ;;  %s834_s0 = inlined_call_operand.vmem [shape: s32[8,128], index: 0, kind: input, shape index: {}]   ;;  %s835_s1 = inlined_call_operand.vmem [shape: s32[8,128], index: 1, kind: input, shape index: {}]   ;;  %s836_s2 = inlined_call_operand.hbm [shape: f32[40,128], index: 2, kind: input, shape index: {}]   ;;  %s837_s3 = inlined_call_operand.hbm [shape: f32[40,128], index: 3, kind: input, shape index: {}]   ;;  %s838_s4 = inlined_call_operand.vmem [shape: f32[8,128], index: 4, kind: output, shape index: {}]  }
   0x1   :  { %10 = vsyncpa [#allocation5], 0  ;;  %s597_s15 = smov [#allocation2]   ;;  %s549_s19 = scalar_lea.hbm %s836_s2, 640 }
   0x2   :  { %s20_s16 = sshll.u32 %s597_s15, 4  ;;  %p550_p0 = scmp.ne.s32.totalorder %s836_s2, %s549_s19  ;;  %s21_s16 = int_to_ptr.vmem [resolvable:$true] %s20_s16 }
   0x3   :  { %p553_p1 = scmp.lt.u32.totalorder %s549_s19, %s836_s2 }
   0x5   :  { %p555_p2 = pnand %p553_p1, %p550_p0 }
   0x7   :  { %558 = shalt.err (!%p555_p2)
}
   0x8   :  { %s559_s24 = scalar_lea.vmem %s21_s16, 640  ;;  %p564_p4 = scmp.lt.s32.totalorder %s21_s16, %s21_s16 }
   0x9   :  { %p560_p3 = scmp.ne.s32.totalorder %s21_s16, %s559_s24  ;;  %p565_p5 = scmp.lt.s32.totalorder %s559_s24, %s559_s24 }
   0xb   :  { %p566_p6 = por %p565_p5, %p564_p4 }
   0xd   :  { %p567_p7 = pnand %p566_p6, %p560_p3 }
   0xf   :  { %570 = shalt.err (!%p567_p7)
}
  0x10   :  { %s598_s25 = smov 128   ;;  %s599_s26 = smov 8  }
  0x11   :  { %26 = dma.hbm_to_vmem [thread:$0]  %s836_s2, 640, %s21_s16, [#allocation3], %s598_s25, %s598_s25, %s599_s26  }
  0x12   :  { %s600_s29 = smov [#allocation4]   ;;  %s571_s7 = scalar_lea.hbm %s837_s3, 640 }
  0x13   :  { %s32_s30 = sshll.u32 %s600_s29, 4  ;;  %p572_p8 = scmp.ne.s32.totalorder %s837_s3, %s571_s7  ;;  %s33_s30 = int_to_ptr.vmem [resolvable:$true] %s32_s30 }
  0x14   :  { %p575_p9 = scmp.lt.u32.totalorder %s571_s7, %s837_s3 }
  0x16   :  { %p577_p10 = pnand %p575_p9, %p572_p8 }
  0x18   :  { %580 = shalt.err (!%p577_p10)
}
  0x19   :  { %s581_s12 = scalar_lea.vmem %s33_s30, 640  ;;  %p586_p12 = scmp.lt.s32.totalorder %s33_s30, %s33_s30 }
  0x1a   :  { %p582_p11 = scmp.ne.s32.totalorder %s33_s30, %s581_s12  ;;  %p587_p13 = scmp.lt.s32.totalorder %s581_s12, %s581_s12 }
  0x1c   :  { %p588_p0 = por %p587_p13, %p586_p12 }
  0x1e   :  { %p589_p1 = pnand %p588_p0, %p582_p11 }
  0x20   :  { %592 = shalt.err (!%p589_p1)
}
  0x21   :  { %38 = dma.hbm_to_vmem [thread:$0]  %s837_s3, 640, %s33_s30, [#allocation5], %s598_s25, %s598_s25, %s599_s26  }
  0x22   :  { %593 = dma.done.wait [#allocation3], 640  }
  0x23   :  { %594 = vsyncadd [#allocation3], 4294966656 }
  0x24   :  { %595 = dma.done.wait [#allocation5], 640  }
  0x25   :  { %596 = vsyncadd [#allocation5], 4294966656  ;;  %v57_v0 = vlaneseq  ;;  %v656_v3 = vld [vmem:[%s834_s0] sm:$0xff]  ;;  %v672_v10 = vld [vmem:[#allocation2 + $0x10] sm:$0xff]  ;;  %vm481_vm0 = vcmask 1040384   ;;  %vm483_vm1 = vcmask 1041408  }
  0x26   :  { %v56_v5 = vld [vmem:[%s835_s1] sm:$0xff]  ;;  %v678_v12 = vld [vmem:[#allocation2 + $0x18] sm:$0xff]  ;;  %v680_v13 = vld [vmem:[#allocation2 + $0x8] sm:$0xff]  ;;  %vm485_vm2 = vcmask 1042432   ;;  %vm487_vm3 = vcmask 1043456   ;;  %vm489_vm4 = vcmask 1044480  }
  0x27   :  { %v650_v1 = vshrl.u32 %v57_v0, 7  ;;  %v674_v11 = vld [vmem:[#allocation2] sm:$0xff]  ;;  %v687_v16 = vld [vmem:[#allocation4] sm:$0xff]  ;;  %v690_v17 = vld [vmem:[#allocation4 + $0x10] sm:$0xff]  ;;  %vm491_vm5 = vcmask 1045504   ;;  %vm493_vm6 = vcmask 1046528  }
  0x28   :  { %v684_v15 = vld [vmem:[#allocation2 + $0x20] sm:$0xff]  ;;  %v692_v18 = vld [vmem:[#allocation4 + $0x8] sm:$0xff]  ;;  %v700_v22 = vld [vmem:[#allocation4 + $0x20] sm:$0xff] }
  0x29   :  { %v59_v2 = vsub.s32 0, %v650_v1  ;;  %v218_v4 = vsub.s32 3, %v650_v1  ;;  %v271_v7 = vsub.s32 4, %v650_v1  ;;  %v112_v19 = vsub.s32 1, %v650_v1  ;;  %v698_v21 = vld [vmem:[#allocation4 + $0x18] sm:$0xff] }
  0x2a   :  { %v430_v20 = vsub.s32 7, %v650_v1  ;;  %v324_v25 = vsub.s32 5, %v650_v1  ;;  %v165_v28 = vsub.s32 2, %v650_v1  ;;  %v377_v31 = vsub.s32 6, %v650_v1 }
  0x2b   :  { %v60_v6 = vrot.slane %v656_v3, %v59_v2  ;;  %v666_v8 = vrot.slane %v56_v5, %v218_v4  ;;  %v670_v9 = vrot.slane %v56_v5, %v271_v7  ;;  %v79_v14 = vrot.slane %v56_v5, %v59_v2 }
  0x2c   :  { %v704_v23 = vrot.slane %v56_v5, %v430_v20  ;;  %v113_v24 = vrot.slane %v656_v3, %v112_v19  ;;  %v710_v26 = vrot.slane %v56_v5, %v324_v25  ;;  %v132_v27 = vrot.slane %v56_v5, %v112_v19 }
  0x2d   :  { %507 = vset.pattern.permute.xlu1 %v60_v6  ;;  %506 = vset.pattern.permute.xlu0 %v60_v6  ;;  %v166_v29 = vrot.slane %v656_v3, %v165_v28  ;;  %v185_v30 = vrot.slane %v56_v5, %v165_v28  ;;  %v729_v32 = vrot.slane %v56_v5, %v377_v31 }
  0x2e   :  { %v219_v33 = vrot.slane %v656_v3, %v218_v4  ;;  %v272_v34 = vrot.slane %v656_v3, %v271_v7  ;;  %v325_v35 = vrot.slane %v656_v3, %v324_v25  ;;  %v780_v54 = vrot.slane %v656_v3, %v377_v31 }
  0x2f   :  { %v790_v60 = vrot.slane %v656_v3, %v430_v20 }
  0x31   :  { %68 = vperm.xlu1 %507, %v672_v10   ;;  %62 = vperm.xlu0 %506, %v674_v11  }
  0x35   :  { %71 = vperm.xlu1 %507, %v678_v12   ;;  %65 = vperm.xlu0 %506, %v680_v13  }
  0x39   :  { %508 = vset.pattern.permute.xlu1 %v79_v14  ;;  %74 = vperm.xlu0 %506, %v684_v15  }
  0x3d   :  { %81 = vperm.xlu1 %508, %v687_v16   ;;  %509 = vset.pattern.permute.xlu0 %v79_v14 }
  0x41   :  { %87 = vperm.xlu1 %508, %v690_v17   ;;  %84 = vperm.xlu0 %509, %v692_v18  }
  0x45   :  { %90 = vperm.xlu1 %508, %v698_v21   ;;  %93 = vperm.xlu0 %509, %v700_v22  }
  0x49   :  { %510 = vset.pattern.permute.xlu1 %v113_v24  ;;  %511 = vset.pattern.permute.xlu0 %v113_v24 }
  0x4d   :  { %115 = vperm.xlu1 %510, %v674_v11   ;;  %118 = vperm.xlu0 %511, %v680_v13  }
  0x51   :  { %121 = vperm.xlu1 %510, %v672_v10   ;;  %127 = vperm.xlu0 %511, %v684_v15  }
  0x55   :  { %124 = vperm.xlu1 %510, %v678_v12   ;;  %513 = vset.pattern.permute.xlu0 %v132_v27 }
  0x59   :  { %512 = vset.pattern.permute.xlu1 %v132_v27  ;;  %137 = vperm.xlu0 %513, %v692_v18  }
  0x5d   :  { %134 = vperm.xlu1 %512, %v687_v16   ;;  %146 = vperm.xlu0 %513, %v700_v22  }
  0x61   :  { %140 = vperm.xlu1 %512, %v690_v17   ;;  %515 = vset.pattern.permute.xlu0 %v166_v29 }
  0x65   :  { %143 = vperm.xlu1 %512, %v698_v21   ;;  %171 = vperm.xlu0 %515, %v680_v13  }
  0x69   :  { %514 = vset.pattern.permute.xlu1 %v166_v29  ;;  %180 = vperm.xlu0 %515, %v684_v15  }
  0x6d   :  { %168 = vperm.xlu1 %514, %v674_v11   ;;  %517 = vset.pattern.permute.xlu0 %v185_v30 }
  0x71   :  { %174 = vperm.xlu1 %514, %v672_v10   ;;  %190 = vperm.xlu0 %517, %v692_v18  }
  0x75   :  { %177 = vperm.xlu1 %514, %v678_v12   ;;  %199 = vperm.xlu0 %517, %v700_v22  }
  0x79   :  { %516 = vset.pattern.permute.xlu1 %v185_v30  ;;  %519 = vset.pattern.permute.xlu0 %v219_v33 }
  0x7d   :  { %187 = vperm.xlu1 %516, %v687_v16   ;;  %224 = vperm.xlu0 %519, %v680_v13  }
  0x81   :  { %193 = vperm.xlu1 %516, %v690_v17   ;;  %233 = vperm.xlu0 %519, %v684_v15  }
  0x85   :  { %196 = vperm.xlu1 %516, %v698_v21   ;;  %521 = vset.pattern.permute.xlu0 %v666_v8 }
  0x89   :  { %518 = vset.pattern.permute.xlu1 %v219_v33  ;;  %243 = vperm.xlu0 %521, %v692_v18  }
  0x8d   :  { %221 = vperm.xlu1 %518, %v674_v11   ;;  %252 = vperm.xlu0 %521, %v700_v22  }
  0x91   :  { %227 = vperm.xlu1 %518, %v672_v10   ;;  %523 = vset.pattern.permute.xlu0 %v272_v34 }
  0x95   :  { %230 = vperm.xlu1 %518, %v678_v12   ;;  %277 = vperm.xlu0 %523, %v680_v13  }
  0x99   :  { %520 = vset.pattern.permute.xlu1 %v666_v8  ;;  %286 = vperm.xlu0 %523, %v684_v15  }
  0x9d   :  { %240 = vperm.xlu1 %520, %v687_v16   ;;  %525 = vset.pattern.permute.xlu0 %v670_v9 }
  0xa1   :  { %246 = vperm.xlu1 %520, %v690_v17   ;;  %296 = vperm.xlu0 %525, %v692_v18  }
  0xa5   :  { %249 = vperm.xlu1 %520, %v698_v21   ;;  %305 = vperm.xlu0 %525, %v700_v22  }
  0xa9   :  { %522 = vset.pattern.permute.xlu1 %v272_v34  ;;  %527 = vset.pattern.permute.xlu0 %v325_v35 }
  0xad   :  { %274 = vperm.xlu1 %522, %v674_v11   ;;  %330 = vperm.xlu0 %527, %v680_v13  }
  0xb0   :  { %v63_v36 = vpop.permute.xlu0 %62  ;;  %v69_v37 = vpop.permute.xlu1 %68 }
  0xb1   :  { %280 = vperm.xlu1 %522, %v672_v10   ;;  %339 = vperm.xlu0 %527, %v684_v15  }
  0xb4   :  { %v66_v38 = vpop.permute.xlu0 %65  ;;  %v72_v39 = vpop.permute.xlu1 %71 }
  0xb5   :  { %283 = vperm.xlu1 %522, %v678_v12   ;;  %533 = vset.pattern.permute.xlu0 %v704_v23 }
  0xb8   :  { %v75_v40 = vpop.permute.xlu0 %74 }
  0xb9   :  { %524 = vset.pattern.permute.xlu1 %v670_v9  ;;  %455 = vperm.xlu0 %533, %v692_v18  }
  0xbc   :  { %v82_v41 = vpop.permute.xlu1 %81 }
  0xbd   :  { %v95_v42 = vmul.f32 %v82_v41, %v63_v36  ;;  %293 = vperm.xlu1 %524, %v687_v16   ;;  %534 = vset.pattern.permute.xlu0 %v710_v26 }
  0xc0   :  { %v88_v43 = vpop.permute.xlu1 %87  ;;  %v85_v44 = vpop.permute.xlu0 %84 }
  0xc1   :  { %v97_v45 = vmul.f32 %v88_v43, %v69_v37  ;;  %v96_v46 = vmul.f32 %v85_v44, %v66_v38  ;;  %299 = vperm.xlu1 %524, %v690_v17   ;;  %349 = vperm.xlu0 %534, %v692_v18  }
  0xc3   :  { %v100_v47 = vadd.f32 %v96_v46, %v95_v42 }
  0xc4   :  { %v91_v48 = vpop.permute.xlu1 %90  ;;  %v94_v49 = vpop.permute.xlu0 %93 }
  0xc5   :  { %v98_v50 = vmul.f32 %v91_v48, %v72_v39  ;;  %v101_v51 = vadd.f32 %v100_v47, %v97_v45  ;;  %302 = vperm.xlu1 %524, %v698_v21   ;;  %v99_v52 = vmul.f32 %v94_v49, %v75_v40  ;;  %355 = vperm.xlu0 %534, %v698_v21  }
  0xc7   :  { %v102_v53 = vadd.f32 %v101_v51, %v98_v50 }
  0xc9   :  { %v103_v55 = vadd.f32 %v102_v53, %v99_v52  ;;  %526 = vset.pattern.permute.xlu1 %v325_v35  ;;  %537 = vset.pattern.permute.xlu0 %v780_v54 }
  0xcb   :  { %v104_v6 = vrot.slane %v103_v55, 4 }
  0xcc   :  { %v116_v56 = vpop.permute.xlu1 %115  ;;  %v119_v57 = vpop.permute.xlu0 %118 }
  0xcd   :  { %327 = vperm.xlu1 %526, %v674_v11   ;;  %383 = vperm.xlu0 %537, %v680_v13   ;;  %v105_v19 = vadd.f32 %v104_v6, %v103_v55 }
  0xcf   :  { %v106_v25 = vrot.slane %v105_v19, 2 }
  0xd0   :  { %v122_v58 = vpop.permute.xlu1 %121  ;;  %v128_v59 = vpop.permute.xlu0 %127 }
  0xd1   :  { %333 = vperm.xlu1 %526, %v672_v10   ;;  %389 = vperm.xlu0 %537, %v678_v12   ;;  %v107_v30 = vadd.f32 %v106_v25, %v105_v19 }
  0xd3   :  { %v108_v35 = vrot.slane %v107_v30, 1 }
  0xd4   :  { %v125_v61 = vpop.permute.xlu1 %124 }
  0xd5   :  { %336 = vperm.xlu1 %526, %v678_v12   ;;  %540 = vset.pattern.permute.xlu0 %v790_v60  ;;  %v109_v40 = vadd.f32 %v108_v35, %v107_v30 }
  0xd8   :  { %v138_v62 = vpop.permute.xlu0 %137 }
  0xd9   :  { %528 = vset.pattern.permute.xlu1 %v710_v26  ;;  %v149_v63 = vmul.f32 %v138_v62, %v119_v57  ;;  %433 = vperm.xlu0 %540, %v674_v11  }
  0xdc   :  { %v135_v0 = vpop.permute.xlu1 %134  ;;  %v147_v2 = vpop.permute.xlu0 %146 }
  0xdd   :  { %v148_v4 = vmul.f32 %v135_v0, %v116_v56  ;;  %346 = vperm.xlu1 %528, %v687_v16   ;;  %v152_v1 = vmul.f32 %v147_v2, %v128_v59  ;;  %442 = vperm.xlu0 %540, %v678_v12  }
  0xdf   :  { %v153_v3 = vadd.f32 %v149_v63, %v148_v4 }
  0xe0   :  { %v141_v5 = vpop.permute.xlu1 %140 }
  0xe1   :  { %v150_v7 = vmul.f32 %v141_v5, %v122_v58  ;;  %352 = vperm.xlu1 %528, %v690_v17   ;;  %545 = vset.pattern.permute.xlu0 %v729_v32 }
  0xe3   :  { %v154_v8 = vadd.f32 %v153_v3, %v150_v7 }
  0xe4   :  { %v144_v9 = vpop.permute.xlu1 %143  ;;  %v172_v14 = vpop.permute.xlu0 %171 }
  0xe5   :  { %v151_v20 = vmul.f32 %v144_v9, %v125_v61  ;;  %529 = vset.pattern.permute.xlu1 %v780_v54  ;;  %411 = vperm.xlu0 %545, %v700_v22  }
  0xe7   :  { %v155_v24 = vadd.f32 %v154_v8, %v151_v20 }
  0xe8   :  { %v181_v27 = vpop.permute.xlu0 %180 }
  0xe9   :  { %v156_v12 = vadd.f32 %v155_v24, %v152_v1  ;;  %380 = vperm.xlu1 %529, %v674_v11   ;;  %548 = vset.pattern.permute.xlu0 %v704_v23 }
  0xeb   :  { %v157_v28 = vrot.slane %v156_v12, 4 }
  0xec   :  { %v169_v29 = vpop.permute.xlu1 %168 }
  0xed   :  { %v158_v31 = vadd.f32 %v157_v28, %v156_v12  ;;  %530 = vset.pattern.permute.xlu1 %v729_v32 }
  0xef   :  { %v159_v33 = vrot.slane %v158_v31, 2 }
  0xf0   :  { %v191_v34 = vpop.permute.xlu0 %190  ;;  %v175_v38 = vpop.permute.xlu1 %174 }
  0xf1   :  { %v160_v36 = vadd.f32 %v159_v33, %v158_v31  ;;  %399 = vperm.xlu1 %530, %v687_v16   ;;  %v202_v37 = vmul.f32 %v191_v34, %v172_v14 }
  0xf3   :  { %v161_v39 = vrot.slane %v160_v36, 1 }
  0xf4   :  { %v200_v11 = vpop.permute.xlu0 %199  ;;  %v178_v44 = vpop.permute.xlu1 %177 }
  0xf5   :  { %v162_v41 = vadd.f32 %v161_v39, %v160_v36  ;;  %402 = vperm.xlu1 %530, %v692_v18   ;;  %v205_v42 = vmul.f32 %v200_v11, %v181_v27 }
  0xf7   :  { %v482_v43 = vsel %vm481_vm0, %v109_v40, %v162_v41 }
  0xf9   :  { %531 = vset.pattern.permute.xlu1 %v790_v60 }
  0xfc   :  { %v188_v45 = vpop.permute.xlu1 %187 }
  0xfd   :  { %v201_v46 = vmul.f32 %v188_v45, %v169_v29  ;;  %436 = vperm.xlu1 %531, %v680_v13   ;;  %v225_v13 = vpop.permute.xlu0 %224 }
  0xff   :  { %v206_v47 = vadd.f32 %v202_v37, %v201_v46 }
 0x100   :  { %v194_v48 = vpop.permute.xlu1 %193 }
 0x101   :  { %v203_v49 = vmul.f32 %v194_v48, %v175_v38  ;;  %532 = vset.pattern.permute.xlu1 %v704_v23  ;;  %v234_v63 = vpop.permute.xlu0 %233 }
 0x103   :  { %v207_v50 = vadd.f32 %v206_v47, %v203_v49 }
 0x104   :  { %v197_v51 = vpop.permute.xlu1 %196 }
 0x105   :  { %v204_v52 = vmul.f32 %v197_v51, %v178_v44  ;;  %452 = vperm.xlu1 %532, %v687_v16  }
 0x107   :  { %v208_v18 = vadd.f32 %v207_v50, %v204_v52 }
 0x108   :  { %v244_v4 = vpop.permute.xlu0 %243 }
 0x109   :  { %v209_v53 = vadd.f32 %v208_v18, %v205_v42  ;;  %535 = vset.pattern.permute.xlu1 %v780_v54  ;;  %v255_v5 = vmul.f32 %v244_v4, %v225_v13 }
 0x10b   :  { %v210_v55 = vrot.slane %v209_v53, 4 }
 0x10c   :  { %v222_v56 = vpop.permute.xlu1 %221  ;;  %v253_v9 = vpop.permute.xlu0 %252 }
 0x10d   :  { %v211_v57 = vadd.f32 %v210_v55, %v209_v53  ;;  %386 = vperm.xlu1 %535, %v672_v10   ;;  %v258_v24 = vmul.f32 %v253_v9, %v234_v63 }
 0x10f   :  { %v212_v58 = vrot.slane %v211_v57, 2 }
 0x110   :  { %v228_v61 = vpop.permute.xlu1 %227 }
 0x111   :  { %v213_v59 = vadd.f32 %v212_v58, %v211_v57  ;;  %536 = vset.pattern.permute.xlu1 %v729_v32 }
 0x113   :  { %v214_v62 = vrot.slane %v213_v59, 1 }
 0x114   :  { %v231_v2 = vpop.permute.xlu1 %230 }
 0x115   :  { %v215_v0 = vadd.f32 %v214_v62, %v213_v59  ;;  %405 = vperm.xlu1 %536, %v690_v17  }
 0x117   :  { %v484_v16 = vsel %vm483_vm1, %v482_v43, %v215_v0 }
 0x119   :  { %538 = vset.pattern.permute.xlu1 %v790_v60 }
 0x11c   :  { %v241_v1 = vpop.permute.xlu1 %240 }
 0x11d   :  { %v254_v3 = vmul.f32 %v241_v1, %v222_v56  ;;  %439 = vperm.xlu1 %538, %v672_v10   ;;  %v278_v10 = vpop.permute.xlu0 %277 }
 0x11f   :  { %v259_v7 = vadd.f32 %v255_v5, %v254_v3 }
 0x120   :  { %v247_v6 = vpop.permute.xlu1 %246 }
 0x121   :  { %v256_v8 = vmul.f32 %v247_v6, %v228_v61  ;;  %539 = vset.pattern.permute.xlu1 %v704_v23  ;;  %v287_v35 = vpop.permute.xlu0 %286 }
 0x123   :  { %v260_v14 = vadd.f32 %v259_v7, %v256_v8 }
 0x124   :  { %v250_v19 = vpop.permute.xlu1 %249 }
 0x125   :  { %v257_v20 = vmul.f32 %v250_v19, %v231_v2  ;;  %458 = vperm.xlu1 %539, %v690_v17  }
 0x127   :  { %v261_v25 = vadd.f32 %v260_v14, %v257_v20 }
 0x129   :  { %v262_v12 = vadd.f32 %v261_v25, %v258_v24  ;;  %541 = vset.pattern.permute.xlu1 %v729_v32  ;;  %v297_v32 = vpop.permute.xlu0 %296 }
 0x12a   :  { %v308_v11 = vmul.f32 %v297_v32, %v278_v10 }
 0x12b   :  { %v263_v27 = vrot.slane %v262_v12, 4 }
 0x12c   :  { %v275_v28 = vpop.permute.xlu1 %274 }
 0x12d   :  { %v264_v29 = vadd.f32 %v263_v27, %v262_v12  ;;  %408 = vperm.xlu1 %541, %v698_v21   ;;  %v306_v42 = vpop.permute.xlu0 %305 }
 0x12e   :  { %v311_v45 = vmul.f32 %v306_v42, %v287_v35 }
 0x12f   :  { %v265_v30 = vrot.slane %v264_v29, 2 }
 0x130   :  { %v281_v33 = vpop.permute.xlu1 %280 }
 0x131   :  { %v266_v31 = vadd.f32 %v265_v30, %v264_v29  ;;  %542 = vset.pattern.permute.xlu1 %v710_v26  ;;  %v331_v48 = vpop.permute.xlu0 %330 }
 0x133   :  { %v267_v34 = vrot.slane %v266_v31, 1 }
 0x134   :  { %v284_v37 = vpop.permute.xlu1 %283 }
 0x135   :  { %v268_v17 = vadd.f32 %v267_v34, %v266_v31  ;;  %358 = vperm.xlu1 %542, %v700_v22   ;;  %v340_v52 = vpop.permute.xlu0 %339 }
 0x137   :  { %v486_v36 = vsel %vm485_vm2, %v484_v16, %v268_v17 }
 0x139   :  { %543 = vset.pattern.permute.xlu1 %v704_v23  ;;  %v456_v56 = vpop.permute.xlu0 %455 }
 0x13c   :  { %v294_v38 = vpop.permute.xlu1 %293 }
 0x13d   :  { %v307_v39 = vmul.f32 %v294_v38, %v275_v28  ;;  %461 = vperm.xlu1 %543, %v698_v21  }
 0x13f   :  { %v312_v41 = vadd.f32 %v308_v11, %v307_v39 }
 0x140   :  { %v300_v40 = vpop.permute.xlu1 %299 }
 0x141   :  { %v309_v26 = vmul.f32 %v300_v40, %v281_v33  ;;  %544 = vset.pattern.permute.xlu1 %v780_v54 }
 0x143   :  { %v313_v43 = vadd.f32 %v312_v41, %v309_v26 }
 0x144   :  { %v303_v44 = vpop.permute.xlu1 %302 }
 0x145   :  { %v310_v46 = vmul.f32 %v303_v44, %v284_v37  ;;  %392 = vperm.xlu1 %544, %v684_v15  }
 0x147   :  { %v314_v47 = vadd.f32 %v313_v43, %v310_v46 }
 0x149   :  { %v315_v49 = vadd.f32 %v314_v47, %v311_v45  ;;  %546 = vset.pattern.permute.xlu1 %v790_v60  ;;  %v350_v60 = vpop.permute.xlu0 %349 }
 0x14a   :  { %v361_v61 = vmul.f32 %v350_v60, %v331_v48 }
 0x14b   :  { %v316_v50 = vrot.slane %v315_v49, 4 }
 0x14c   :  { %v328_v51 = vpop.permute.xlu1 %327 }
 0x14d   :  { %v317_v21 = vadd.f32 %v316_v50, %v315_v49  ;;  %445 = vperm.xlu1 %546, %v684_v15   ;;  %v356_v63 = vpop.permute.xlu0 %355 }
 0x14f   :  { %v318_v18 = vrot.slane %v317_v21, 2 }
 0x150   :  { %v334_v53 = vpop.permute.xlu1 %333 }
 0x151   :  { %v319_v54 = vadd.f32 %v318_v18, %v317_v21  ;;  %547 = vset.pattern.permute.xlu1 %v704_v23  ;;  %v384_v19 = vpop.permute.xlu0 %383 }
 0x153   :  { %v320_v55 = vrot.slane %v319_v54, 1 }
 0x154   :  { %v337_v58 = vpop.permute.xlu1 %336 }
 0x155   :  { %v321_v57 = vadd.f32 %v320_v55, %v319_v54  ;;  %464 = vperm.xlu1 %547, %v700_v22   ;;  %v363_v2 = vmul.f32 %v356_v63, %v337_v58  ;;  %v390_v24 = vpop.permute.xlu0 %389 }
 0x157   :  { %v488_v13 = vsel %vm487_vm3, %v486_v36, %v321_v57 }
 0x159   :  { %v434_v29 = vpop.permute.xlu0 %433 }
 0x15c   :  { %v347_v59 = vpop.permute.xlu1 %346 }
 0x15d   :  { %v360_v62 = vmul.f32 %v347_v59, %v328_v51  ;;  %v443_v33 = vpop.permute.xlu0 %442 }
 0x15f   :  { %v365_v0 = vadd.f32 %v361_v61, %v360_v62 }
 0x160   :  { %v353_v15 = vpop.permute.xlu1 %352 }
 0x161   :  { %v362_v16 = vmul.f32 %v353_v15, %v334_v53 }
 0x163   :  { %v366_v4 = vadd.f32 %v365_v0, %v362_v16 }
 0x164   :  { %v412_v39 = vpop.permute.xlu0 %411 }
 0x165   :  { %v367_v23 = vadd.f32 %v366_v4, %v363_v2 }
 0x168   :  { %v381_v1 = vpop.permute.xlu1 %380 }
 0x170   :  { %v400_v3 = vpop.permute.xlu1 %399 }
 0x171   :  { %v413_v35 = vmul.f32 %v400_v3, %v381_v1 }
 0x174   :  { %v403_v5 = vpop.permute.xlu1 %402 }
 0x175   :  { %v414_v31 = vmul.f32 %v403_v5, %v384_v19 }
 0x177   :  { %v418_v32 = vadd.f32 %v414_v31, %v413_v35 }
 0x17c   :  { %v437_v6 = vpop.permute.xlu1 %436 }
 0x17d   :  { %v467_v47 = vmul.f32 %v456_v56, %v437_v6 }
 0x184   :  { %v453_v7 = vpop.permute.xlu1 %452 }
 0x185   :  { %v466_v46 = vmul.f32 %v453_v7, %v434_v29 }
 0x187   :  { %v471_v51 = vadd.f32 %v467_v47, %v466_v46 }
 0x18c   :  { %v387_v8 = vpop.permute.xlu1 %386 }
 0x194   :  { %v406_v22 = vpop.permute.xlu1 %405 }
 0x195   :  { %v415_v17 = vmul.f32 %v406_v22, %v387_v8 }
 0x197   :  { %v419_v40 = vadd.f32 %v418_v32, %v415_v17 }
 0x19c   :  { %v440_v9 = vpop.permute.xlu1 %439 }
 0x1a4   :  { %v459_v14 = vpop.permute.xlu1 %458 }
 0x1a5   :  { %v468_v48 = vmul.f32 %v459_v14, %v440_v9 }
 0x1ac   :  { %v409_v20 = vpop.permute.xlu1 %408 }
 0x1ad   :  { %v416_v38 = vmul.f32 %v409_v20, %v390_v24 }
 0x1af   :  { %v420_v43 = vadd.f32 %v419_v40, %v416_v38 }
 0x1b4   :  { %v359_v25 = vpop.permute.xlu1 %358 }
 0x1b5   :  { %v364_v12 = vmul.f32 %v359_v25, %v340_v52  ;;  %v472_v52 = vadd.f32 %v471_v51, %v468_v48 }
 0x1b7   :  { %v368_v27 = vadd.f32 %v367_v23, %v364_v12 }
 0x1b9   :  { %v369_v28 = vrot.slane %v368_v27, 4 }
 0x1bb   :  { %v370_v10 = vadd.f32 %v369_v28, %v368_v27 }
 0x1bc   :  { %v462_v36 = vpop.permute.xlu1 %461 }
 0x1bd   :  { %v371_v30 = vrot.slane %v370_v10, 2  ;;  %v469_v21 = vmul.f32 %v462_v36, %v443_v33 }
 0x1bf   :  { %v372_v34 = vadd.f32 %v371_v30, %v370_v10  ;;  %v473_v53 = vadd.f32 %v472_v52, %v469_v21 }
 0x1c1   :  { %v373_v37 = vrot.slane %v372_v34, 1 }
 0x1c3   :  { %v374_v11 = vadd.f32 %v373_v37, %v372_v34 }
 0x1c4   :  { %v393_v41 = vpop.permute.xlu1 %392 }
 0x1c5   :  { %v490_v26 = vsel %vm489_vm4, %v488_v13, %v374_v11  ;;  %v417_v42 = vmul.f32 %v412_v39, %v393_v41 }
 0x1c7   :  { %v421_v44 = vadd.f32 %v420_v43, %v417_v42 }
 0x1c9   :  { %v422_v45 = vrot.slane %v421_v44, 4 }
 0x1cb   :  { %v423_v49 = vadd.f32 %v422_v45, %v421_v44 }
 0x1cc   :  { %v446_v50 = vpop.permute.xlu1 %445 }
 0x1cd   :  { %v424_v18 = vrot.slane %v423_v49, 2 }
 0x1cf   :  { %v425_v58 = vadd.f32 %v424_v18, %v423_v49 }
 0x1d1   :  { %v426_v59 = vrot.slane %v425_v58, 1 }
 0x1d3   :  { %v427_v63 = vadd.f32 %v426_v59, %v425_v58 }
 0x1d4   :  { %v465_v54 = vpop.permute.xlu1 %464 }
 0x1d5   :  { %v470_v55 = vmul.f32 %v465_v54, %v446_v50  ;;  %v492_v0 = vsel %vm491_vm5, %v490_v26, %v427_v63 }
 0x1d7   :  { %v474_v57 = vadd.f32 %v473_v53, %v470_v55 }
 0x1d9   :  { %v475_v60 = vrot.slane %v474_v57, 4 }
 0x1db   :  { %v476_v13 = vadd.f32 %v475_v60, %v474_v57 }
 0x1dd   :  { %v477_v61 = vrot.slane %v476_v13, 2 }
 0x1df   :  { %v478_v62 = vadd.f32 %v477_v61, %v476_v13 }
 0x1e1   :  { %v479_v56 = vrot.slane %v478_v62, 1 }
 0x1e3   :  { %v480_v15 = vadd.f32 %v479_v56, %v478_v62 }
 0x1e5   :  { %v494_v16 = vsel %vm493_vm6, %v492_v0, %v480_v15 }
 0x1e6   :  { %495 = vst [vmem:[%s838_s4] sm:$0xff] %v494_v16 }
 0x1e7   :  { %500 = vsyncpa [#allocation3], 1 }
 0x1e8   :  { %501 = vsyncpa [#allocation5], 1 }

</bundles_post_ra>
